<compile_context>
chip_gen: v7x
topology: tpu7x:2x2x1
jax: 0.10.0
libtpu: 0.0.40
codegen_flags: <defaults>
</compile_context>

<pallas_src>
import jax
import jax.numpy as jnp
from jax.experimental import pallas as pl
from jax.experimental.pallas import tpu as pltpu

_NEG_INF = -1e30  # fill for padded action lanes (keeps log-softmax exact)


def actor_mlp_kernel(x_ref, w1_ref, b1_ref, w2_ref, b2_ref, w3_ref, b3_ref,
                     logits_ref, logp_ref):
    """Hot path: 3 bf16-operand MXU matmuls (f32 accum) + tanh + log-softmax."""
    x = x_ref[...]                                           # (TB, Dp) bf16

    # hidden layer 1: tanh(x @ W1 + b1)   -- bias/activation in f32
    h1 = jnp.tanh(
        jnp.dot(x, w1_ref[...], preferred_element_type=jnp.float32)
        + b1_ref[...]                                        # (1, Hp) broadcast
    )

    # hidden layer 2: tanh(h1 @ W2 + b2)
    h2 = jnp.tanh(
        jnp.dot(h1.astype(jnp.bfloat16), w2_ref[...],
                preferred_element_type=jnp.float32)
        + b2_ref[...]
    )

    # action head: logits = h2 @ W3 + b3   (padded lanes carry -1e30 bias)
    logits = (
        jnp.dot(h2.astype(jnp.bfloat16), w3_ref[...],
                preferred_element_type=jnp.float32)
        + b3_ref[...]
    )                                                        # (TB, Ap) f32

    # FixedCategorical parameters: logits + stable log-probs.  Padded lanes are
    # ~-1e30, so max() sees only real actions and exp() underflows to 0 there.
    m = jnp.max(logits, axis=-1, keepdims=True)
    shifted = logits - m
    lse = jnp.log(jnp.sum(jnp.exp(shifted), axis=-1, keepdims=True))

    logits_ref[...] = logits                                 # lane-dense store
    logp_ref[...] = shifted - lse                            # lane-dense store


def _round_up(n, m):
    return ((n + m - 1) // m) * m


def _pad2(a, rows, cols, fill=0.0):
    return jnp.pad(a, ((0, rows - a.shape[0]), (0, cols - a.shape[1])),
                   constant_values=fill)


def actor_forward(x, params):
    """Wrapper: pad to MXU/lane-friendly shapes once, run a batch-gridded call."""
    w1, b1, w2, b2, w3, b3 = params
    batch, obs_dim = x.shape
    hidden = w1.shape[1]
    num_actions = w3.shape[1]

    # MXU / lane-friendly padded dims.
    d_pad = _round_up(obs_dim, 128)
    h_pad = _round_up(hidden, 128)
    a_pad = _round_up(num_actions, 128)

    # Batch tile: multiple of 8 (sublane), capped at 256; pad batch to a multiple.
    tb = min(256, _round_up(batch, 8))
    b_pad = _round_up(batch, tb)

    # One-time (outside-kernel) padding + bf16 cast of matmul operands.
    xp = _pad2(x, b_pad, d_pad).astype(jnp.bfloat16)
    w1p = _pad2(w1, d_pad, h_pad).astype(jnp.bfloat16)
    w2p = _pad2(w2, h_pad, h_pad).astype(jnp.bfloat16)
    w3p = _pad2(w3, h_pad, a_pad).astype(jnp.bfloat16)
    b1p = _pad2(b1, 1, h_pad).astype(jnp.float32)
    b2p = _pad2(b2, 1, h_pad).astype(jnp.float32)
    b3p = _pad2(b3, 1, a_pad, fill=_NEG_INF).astype(jnp.float32)

    const = lambda a: pl.BlockSpec(a.shape, lambda i: (0, 0))

    out_shapes = (
        jax.ShapeDtypeStruct((b_pad, a_pad), jnp.float32),   # logits (padded)
        jax.ShapeDtypeStruct((b_pad, a_pad), jnp.float32),   # log_probs (padded)
    )

    logits_p, logp_p = pl.pallas_call(
        actor_mlp_kernel,
        out_shape=out_shapes,
        grid=(b_pad // tb,),
        in_specs=[
            pl.BlockSpec((tb, d_pad), lambda i: (i, 0)),     # x: batch-tiled
            const(w1p), const(b1p),                          # weights resident
            const(w2p), const(b2p),
            const(w3p), const(b3p),
        ],
        out_specs=(
            pl.BlockSpec((tb, a_pad), lambda i: (i, 0)),
            pl.BlockSpec((tb, a_pad), lambda i: (i, 0)),
        ),
        compiler_params=pltpu.CompilerParams(
            dimension_semantics=("parallel",)),
    )(xp, w1p, b1p, w2p, b2p, w3p, b3p)

    # Slice away batch / action padding.
    return logits_p[:batch, :num_actions], logp_p[:batch, :num_actions]


def init_params(key, obs_dim, hidden, num_actions):
    """Deterministic synthetic init (standard actor MLP shapes)."""
    k1, k2, k3 = jax.random.split(key, 3)
    scale = lambda fan_in: 1.0 / jnp.sqrt(jnp.float32(fan_in))
    w1 = jax.random.normal(k1, (obs_dim, hidden), jnp.float32) * scale(obs_dim)
    b1 = jnp.zeros((1, hidden), jnp.float32)
    w2 = jax.random.normal(k2, (hidden, hidden), jnp.float32) * scale(hidden)
    b2 = jnp.zeros((1, hidden), jnp.float32)
    w3 = jax.random.normal(k3, (hidden, num_actions), jnp.float32) * scale(hidden)
    b3 = jnp.zeros((1, num_actions), jnp.float32)
    return (w1, b1, w2, b2, w3, b3)


if __name__ == "__main__":
    # Small shapes consistent with a vectorized 1-D observation space + Discrete actions.
    batch, obs_dim, hidden, num_actions = 8, 32, 64, 8

    key = jax.random.PRNGKey(0)
    kx, kp = jax.random.split(key)
    x = jax.random.normal(kx, (batch, obs_dim), jnp.float32)
    params = init_params(kp, obs_dim, hidden, num_actions)

    logits, log_probs = actor_forward(x, params)
    jax.block_until_ready((logits, log_probs))

    assert logits.shape == (batch, num_actions)
    assert log_probs.shape == (batch, num_actions)

    # Reference in plain JAX with the same bf16-operand / f32-accumulate matmuls.
    w1, b1, w2, b2, w3, b3 = params
    xb = x.astype(jnp.bfloat16)
    h1 = jnp.tanh(jnp.dot(xb, w1.astype(jnp.bfloat16),
                          preferred_element_type=jnp.float32) + b1)
    h2 = jnp.tanh(jnp.dot(h1.astype(jnp.bfloat16), w2.astype(jnp.bfloat16),
                          preferred_element_type=jnp.float32) + b2)
    ref_logits = jnp.dot(h2.astype(jnp.bfloat16), w3.astype(jnp.bfloat16),
                         preferred_element_type=jnp.float32) + b3
    ref_logp = jax.nn.log_softmax(ref_logits, axis=-1)

    assert jnp.allclose(logits, ref_logits, atol=1e-3, rtol=1e-3)
    assert jnp.allclose(log_probs, ref_logp, atol=1e-3, rtol=1e-3)

    # Also stay close to the full-f32 forward (bf16 operand quantization only).
    h1f = jnp.tanh(x @ w1 + b1)
    h2f = jnp.tanh(h1f @ w2 + b2)
    f32_logits = h2f @ w3 + b3
    assert jnp.allclose(logits, f32_logits, atol=3e-2, rtol=3e-2)

    # Sanity: log-probs normalize to 1 per row.
    assert jnp.allclose(jnp.sum(jnp.exp(log_probs), axis=-1), 1.0, atol=1e-5)

    # TODO(synk): the base class's `Box` action-space branch (FixedGaussian head)
    # is not exercised here; only the Discrete/FixedCategorical head is implemented.
    print("KERNEL_OK")
</pallas_src>

<mosaic_0001>
module attributes {stable_mosaic.version = 11 : i64} {
  func.func @actor_mlp_kernel(%arg0: i32, %arg1: memref<8x128xbf16, #tpu.memory_space<vmem>>, %arg2: memref<128x128xbf16, #tpu.memory_space<vmem>>, %arg3: memref<1x128xf32, #tpu.memory_space<vmem>>, %arg4: memref<128x128xbf16, #tpu.memory_space<vmem>>, %arg5: memref<1x128xf32, #tpu.memory_space<vmem>>, %arg6: memref<128x128xbf16, #tpu.memory_space<vmem>>, %arg7: memref<1x128xf32, #tpu.memory_space<vmem>>, %arg8: memref<8x128xf32, #tpu.memory_space<vmem>>, %arg9: memref<8x128xf32, #tpu.memory_space<vmem>>) attributes {dimension_semantics = [#tpu.dimension_semantics<parallel>], iteration_bounds = array<i64: 1>, scalar_prefetch = 0 : i64, scratch_operands = 0 : i64, tpu.core_type = #tpu.core_type<tc>, window_params = [{transform_indices = @transform_0, window_bounds = array<i64: 8, 128>}, {pipeline_mode = #tpu.pipeline_mode<synchronous>, transform_indices = @transform_1, window_bounds = array<i64: 128, 128>}, {pipeline_mode = #tpu.pipeline_mode<synchronous>, transform_indices = @transform_2, window_bounds = array<i64: 1, 128>}, {pipeline_mode = #tpu.pipeline_mode<synchronous>, transform_indices = @transform_3, window_bounds = array<i64: 128, 128>}, {pipeline_mode = #tpu.pipeline_mode<synchronous>, transform_indices = @transform_4, window_bounds = array<i64: 1, 128>}, {pipeline_mode = #tpu.pipeline_mode<synchronous>, transform_indices = @transform_5, window_bounds = array<i64: 128, 128>}, {pipeline_mode = #tpu.pipeline_mode<synchronous>, transform_indices = @transform_6, window_bounds = array<i64: 1, 128>}, {transform_indices = @transform_7, window_bounds = array<i64: 8, 128>}, {transform_indices = @transform_8, window_bounds = array<i64: 8, 128>}]} {
    %c0 = arith.constant 0 : index
    %c0_0 = arith.constant 0 : index
    %0 = vector.load %arg1[%c0, %c0_0] : memref<8x128xbf16, #tpu.memory_space<vmem>>, vector<8x128xbf16>
    %c0_1 = arith.constant 0 : index
    %c0_2 = arith.constant 0 : index
    %1 = vector.load %arg2[%c0_1, %c0_2] : memref<128x128xbf16, #tpu.memory_space<vmem>>, vector<128x128xbf16>
    %cst = arith.constant dense<0.000000e+00> : vector<8x128xf32>
    %2 = tpu.matmul %0, %1, %cst {dimension_numbers = #tpu.dot_dimension_numbers<[1], [0], [0], [1], [0, 0, 1, 1], [], []>} : vector<8x128xbf16>, vector<128x128xbf16>, vector<8x128xf32> -> vector<8x128xf32>
    %c0_3 = arith.constant 0 : index
    %c0_4 = arith.constant 0 : index
    %3 = vector.load %arg3[%c0_3, %c0_4] : memref<1x128xf32, #tpu.memory_space<vmem>>, vector<1x128xf32>
    %4 = vector.broadcast %3 : vector<1x128xf32> to vector<8x128xf32>
    %5 = arith.addf %2, %4 : vector<8x128xf32>
    %6 = math.tanh %5 : vector<8x128xf32>
    %7 = arith.truncf %6 : vector<8x128xf32> to vector<8x128xbf16>
    %c0_5 = arith.constant 0 : index
    %c0_6 = arith.constant 0 : index
    %8 = vector.load %arg4[%c0_5, %c0_6] : memref<128x128xbf16, #tpu.memory_space<vmem>>, vector<128x128xbf16>
    %cst_7 = arith.constant dense<0.000000e+00> : vector<8x128xf32>
    %9 = tpu.matmul %7, %8, %cst_7 {dimension_numbers = #tpu.dot_dimension_numbers<[1], [0], [0], [1], [0, 0, 1, 1], [], []>} : vector<8x128xbf16>, vector<128x128xbf16>, vector<8x128xf32> -> vector<8x128xf32>
    %c0_8 = arith.constant 0 : index
    %c0_9 = arith.constant 0 : index
    %10 = vector.load %arg5[%c0_8, %c0_9] : memref<1x128xf32, #tpu.memory_space<vmem>>, vector<1x128xf32>
    %11 = vector.broadcast %10 : vector<1x128xf32> to vector<8x128xf32>
    %12 = arith.addf %9, %11 : vector<8x128xf32>
    %13 = math.tanh %12 : vector<8x128xf32>
    %14 = arith.truncf %13 : vector<8x128xf32> to vector<8x128xbf16>
    %c0_10 = arith.constant 0 : index
    %c0_11 = arith.constant 0 : index
    %15 = vector.load %arg6[%c0_10, %c0_11] : memref<128x128xbf16, #tpu.memory_space<vmem>>, vector<128x128xbf16>
    %cst_12 = arith.constant dense<0.000000e+00> : vector<8x128xf32>
    %16 = tpu.matmul %14, %15, %cst_12 {dimension_numbers = #tpu.dot_dimension_numbers<[1], [0], [0], [1], [0, 0, 1, 1], [], []>} : vector<8x128xbf16>, vector<128x128xbf16>, vector<8x128xf32> -> vector<8x128xf32>
    %c0_13 = arith.constant 0 : index
    %c0_14 = arith.constant 0 : index
    %17 = vector.load %arg7[%c0_13, %c0_14] : memref<1x128xf32, #tpu.memory_space<vmem>>, vector<1x128xf32>
    %18 = vector.broadcast %17 : vector<1x128xf32> to vector<8x128xf32>
    %19 = arith.addf %16, %18 : vector<8x128xf32>
    %cst_15 = arith.constant dense<0xFF800000> : vector<8xf32>
    %20 = vector.multi_reduction <maximumf>, %19, %cst_15 [1] : vector<8x128xf32> to vector<8xf32>
    %21 = vector.shape_cast %20 : vector<8xf32> to vector<8x1xf32>
    %22 = vector.broadcast %21 : vector<8x1xf32> to vector<8x128xf32>
    %23 = arith.subf %19, %22 : vector<8x128xf32>
    %24 = math.exp %23 : vector<8x128xf32>
    %cst_16 = arith.constant dense<0.000000e+00> : vector<8xf32>
    %25 = vector.multi_reduction <add>, %24, %cst_16 [1] : vector<8x128xf32> to vector<8xf32>
    %26 = vector.shape_cast %25 : vector<8xf32> to vector<8x1xf32>
    %27 = math.log %26 : vector<8x1xf32>
    %c0_17 = arith.constant 0 : index
    %c0_18 = arith.constant 0 : index
    %28 = vector.load %arg8[%c0_17, %c0_18] : memref<8x128xf32, #tpu.memory_space<vmem>>, vector<8x128xf32>
    tpu.vector_store %arg8[%c0_17, %c0_18], %19 {strides = array<i32>} : memref<8x128xf32, #tpu.memory_space<vmem>>, vector<8x128xf32>,
    %29 = vector.broadcast %27 : vector<8x1xf32> to vector<8x128xf32>
    %30 = arith.subf %23, %29 : vector<8x128xf32>
    %c0_19 = arith.constant 0 : index
    %c0_20 = arith.constant 0 : index
    %31 = vector.load %arg9[%c0_19, %c0_20] : memref<8x128xf32, #tpu.memory_space<vmem>>, vector<8x128xf32>
    tpu.vector_store %arg9[%c0_19, %c0_20], %30 {strides = array<i32>} : memref<8x128xf32, #tpu.memory_space<vmem>>, vector<8x128xf32>,
    return
  }
  func.func @transform_0(%arg0: i32) -> (i32, i32) {
    %c0_i32 = arith.constant 0 : i32
    %c0_i32_0 = arith.constant 0 : i32
    return %arg0, %c0_i32 : i32, i32
  }
  func.func @transform_1(%arg0: i32) -> (i32, i32) {
    %c0_i32 = arith.constant 0 : i32
    %c0_i32_0 = arith.constant 0 : i32
    %c0_i32_1 = arith.constant 0 : i32
    return %c0_i32, %c0_i32_0 : i32, i32
  }
  func.func @transform_2(%arg0: i32) -> (i32, i32) {
    %c0_i32 = arith.constant 0 : i32
    %c0_i32_0 = arith.constant 0 : i32
    %c0_i32_1 = arith.constant 0 : i32
    return %c0_i32, %c0_i32_0 : i32, i32
  }
  func.func @transform_3(%arg0: i32) -> (i32, i32) {
    %c0_i32 = arith.constant 0 : i32
    %c0_i32_0 = arith.constant 0 : i32
    %c0_i32_1 = arith.constant 0 : i32
    return %c0_i32, %c0_i32_0 : i32, i32
  }
  func.func @transform_4(%arg0: i32) -> (i32, i32) {
    %c0_i32 = arith.constant 0 : i32
    %c0_i32_0 = arith.constant 0 : i32
    %c0_i32_1 = arith.constant 0 : i32
    return %c0_i32, %c0_i32_0 : i32, i32
  }
  func.func @transform_5(%arg0: i32) -> (i32, i32) {
    %c0_i32 = arith.constant 0 : i32
    %c0_i32_0 = arith.constant 0 : i32
    %c0_i32_1 = arith.constant 0 : i32
    return %c0_i32, %c0_i32_0 : i32, i32
  }
  func.func @transform_6(%arg0: i32) -> (i32, i32) {
    %c0_i32 = arith.constant 0 : i32
    %c0_i32_0 = arith.constant 0 : i32
    %c0_i32_1 = arith.constant 0 : i32
    return %c0_i32, %c0_i32_0 : i32, i32
  }
  func.func @transform_7(%arg0: i32) -> (i32, i32) {
    %c0_i32 = arith.constant 0 : i32
    %c0_i32_0 = arith.constant 0 : i32
    return %arg0, %c0_i32 : i32, i32
  }
  func.func @transform_8(%arg0: i32) -> (i32, i32) {
    %c0_i32 = arith.constant 0 : i32
    %c0_i32_0 = arith.constant 0 : i32
    return %arg0, %c0_i32 : i32, i32
  }
}

</mosaic_0001>

<bundles_post_ra>
// kernel: tpu_custom_call.1
= control target key start
LH: loop header
LB: loop body
LE: loop exit
PB: predicated region body
PF: predicated region fallthrough
CT: control target
= control target key end

     0   :  { %14 = vsyncpa [#allocation3], 0  ;;  %s938_s0 = inlined_call_operand.hbm [shape: bf16[8,128], index: 0, kind: input, shape index: {}]   ;;  %s939_s1 = inlined_call_operand.hbm [shape: bf16[128,128], index: 1, kind: input, shape index: {}]   ;;  %s940_s2 = inlined_call_operand.vmem [shape: f32[1,128], index: 2, kind: input, shape index: {}]   ;;  %s941_s3 = inlined_call_operand.hbm [shape: bf16[128,128], index: 3, kind: input, shape index: {}]   ;;  %s942_s4 = inlined_call_operand.vmem [shape: f32[1,128], index: 4, kind: input, shape index: {}]   ;;  %s943_s5 = inlined_call_operand.hbm [shape: bf16[128,128], index: 5, kind: input, shape index: {}]   ;;  %s944_s6 = inlined_call_operand.vmem [shape: f32[1,128], index: 6, kind: input, shape index: {}]   ;;  %s945_s7 = inlined_call_operand.hbm [shape: f32[8,128], index: 7, kind: output, shape index: {0}]   ;;  %s946_s8 = inlined_call_operand.hbm [shape: f32[8,128], index: 8, kind: output, shape index: {1}]  }
   0x1   :  { %15 = vsyncpa [#allocation6], 0 }
   0x2   :  { %16 = vsyncpa [#allocation9], 0 }
   0x3   :  { %17 = vsyncpa [#allocation4], 0 }
   0x4   :  { %18 = vsyncpa [#allocation12], 0  ;;  %s763_s27 = smov [#allocation5]   ;;  %s621_s9 = scalar_lea.hbm %s939_s1, 1024 }
   0x5   :  { %s34_s28 = sshll.u32 %s763_s27, 4  ;;  %p622_p0 = scmp.ne.s32.totalorder %s939_s1, %s621_s9  ;;  %s35_s28 = int_to_ptr.vmem [resolvable:$true] %s34_s28 }
   0x6   :  { %p625_p1 = scmp.lt.u32.totalorder %s621_s9, %s939_s1 }
   0x8   :  { %p627_p2 = pnand %p625_p1, %p622_p0 }
   0xa   :  { %630 = shalt.err (!%p627_p2)
}
   0xb   :  { %s631_s14 = scalar_lea.vmem %s35_s28, 1024  ;;  %p636_p4 = scmp.lt.s32.totalorder %s35_s28, %s35_s28 }
   0xc   :  { %p632_p3 = scmp.ne.s32.totalorder %s35_s28, %s631_s14  ;;  %p637_p5 = scmp.lt.s32.totalorder %s631_s14, %s631_s14 }
   0xe   :  { %p638_p6 = por %p637_p5, %p636_p4 }
  0x10   :  { %p639_p7 = pnand %p638_p6, %p632_p3 }
  0x12   :  { %642 = shalt.err (!%p639_p7)
}
  0x13   :  { %s764_s15 = smov 64   ;;  %s765_s16 = smov 4  }
  0x14   :  { %40 = dma.hbm_to_vmem [thread:$0]  %s939_s1, 1024, %s35_s28, [#allocation6], %s764_s15, %s764_s15, %s765_s16  }
  0x15   :  { %s766_s19 = smov [#allocation2]   ;;  %s767_s21 = smov [#allocation7]  }
  0x16   :  { %s25_s20 = sshll.u32 %s766_s19, 4  ;;  %s48_s22 = sshll.u32 %s767_s21, 4  ;;  %s26_s20 = int_to_ptr.vmem [resolvable:$true] %s25_s20  ;;  %s49_s22 = int_to_ptr.vmem [resolvable:$true] %s48_s22 }
  0x17   :  { %s643_s25 = scalar_lea.hbm %s938_s0, 64 }
  0x18   :  { %p644_p8 = scmp.ne.s32.totalorder %s938_s0, %s643_s25  ;;  %p647_p9 = scmp.lt.u32.totalorder %s643_s25, %s938_s0 }
  0x1a   :  { %p649_p10 = pnand %p647_p9, %p644_p8 }
  0x1c   :  { %652 = shalt.err (!%p649_p10)
}
  0x1d   :  { %s653_s1 = scalar_lea.vmem %s26_s20, 64  ;;  %p658_p12 = scmp.lt.s32.totalorder %s26_s20, %s26_s20 }
  0x1e   :  { %p654_p11 = scmp.ne.s32.totalorder %s26_s20, %s653_s1  ;;  %p659_p13 = scmp.lt.s32.totalorder %s653_s1, %s653_s1 }
  0x20   :  { %p660_p0 = por %p659_p13, %p658_p12 }
  0x22   :  { %p661_p1 = pnand %p660_p0, %p654_p11 }
  0x24   :  { %664 = shalt.err (!%p661_p1)
}
  0x25   :  { %28 = dma.hbm_to_vmem [thread:$0]  %s938_s0, 64, %s26_s20, [#allocation3]  }
  0x26   :  { %s665_s12 = scalar_lea.hbm %s941_s3, 1024 }
  0x27   :  { %p666_p2 = scmp.ne.s32.totalorder %s941_s3, %s665_s12  ;;  %p669_p3 = scmp.lt.u32.totalorder %s665_s12, %s941_s3 }
  0x29   :  { %p671_p4 = pnand %p669_p3, %p666_p2 }
  0x2b   :  { %674 = shalt.err (!%p671_p4)
}
  0x2c   :  { %s675_s19 = scalar_lea.vmem %s49_s22, 1024  ;;  %p680_p6 = scmp.lt.s32.totalorder %s49_s22, %s49_s22 }
  0x2d   :  { %p676_p5 = scmp.ne.s32.totalorder %s49_s22, %s675_s19  ;;  %p681_p7 = scmp.lt.s32.totalorder %s675_s19, %s675_s19 }
  0x2f   :  { %p682_p8 = por %p681_p7, %p680_p6 }
  0x31   :  { %p683_p9 = pnand %p682_p8, %p676_p5 }
  0x33   :  { %686 = shalt.err (!%p683_p9)
}
  0x34   :  { %54 = dma.hbm_to_vmem [thread:$0]  %s941_s3, 1024, %s49_s22, [#allocation6], %s764_s15, %s764_s15, %s765_s16  }
  0x35   :  { %s768_s21 = smov [#allocation8]   ;;  %s687_s26 = scalar_lea.hbm %s943_s5, 1024 }
  0x36   :  { %s62_s23 = sshll.u32 %s768_s21, 4  ;;  %p688_p10 = scmp.ne.s32.totalorder %s943_s5, %s687_s26  ;;  %s63_s23 = int_to_ptr.vmem [resolvable:$true] %s62_s23 }
  0x37   :  { %p691_p11 = scmp.lt.u32.totalorder %s687_s26, %s943_s5 }
  0x39   :  { %p693_p12 = pnand %p691_p11, %p688_p10 }
  0x3b   :  { %696 = shalt.err (!%p693_p12)
}
  0x3c   :  { %s697_s28 = scalar_lea.vmem %s63_s23, 1024  ;;  %p702_p0 = scmp.lt.s32.totalorder %s63_s23, %s63_s23 }
  0x3d   :  { %p698_p13 = scmp.ne.s32.totalorder %s63_s23, %s697_s28  ;;  %p703_p1 = scmp.lt.s32.totalorder %s697_s28, %s697_s28 }
  0x3f   :  { %p704_p2 = por %p703_p1, %p702_p0 }
  0x41   :  { %p705_p3 = pnand %p704_p2, %p698_p13 }
  0x43   :  { %708 = shalt.err (!%p705_p3)
}
  0x44   :  { %68 = dma.hbm_to_vmem [thread:$0]  %s943_s5, 1024, %s63_s23, [#allocation9], %s764_s15, %s764_s15, %s765_s16  }
  0x45   :  { %753 = dma.done.wait [#allocation3], 64  }
  0x46   :  { %754 = vsyncadd [#allocation3], 4294967232 }
  0x47   :  { %755 = dma.done.wait [#allocation6], 2048  }
  0x48   :  { %756 = vsyncadd [#allocation6], 4294965248 }
  0x49   :  { %757 = dma.done.wait [#allocation9], 1024  }
  0x4a   :  { %758 = vsyncadd [#allocation9], 4294966272  ;;  %v769_v0 = vmov 0.0   ;;  %vm770_vm0 = vmmov 0   ;;  %v589_v1 = vld [vmem:[#allocation5] sm:$0xff]   ;;  %v590_v2 = vld [vmem:[#allocation5 + $0x8] sm:$0xff]  }
  0x4b   :  { %519 = vmatprep.subr.bf16.mxu0 %v769_v0  ;;  %535 = vmatprep.mubr.msk.bf16.mxu0 %vm770_vm0, %v769_v0  ;;  %v591_v3 = vld [vmem:[#allocation5 + $0x10] sm:$0xff]   ;;  %v597_v4 = vld [vmem:[#allocation7] sm:$0xff]   ;;  %v592_v5 = vld [vmem:[#allocation5 + $0x18] sm:$0xff]  }
  0x4c   :  { %539 = vmatprep.subr.bf16.mxu1 %v769_v0  ;;  %555 = vmatprep.mubr.msk.bf16.mxu1 %vm770_vm0, %v769_v0  ;;  %v598_v6 = vld [vmem:[#allocation7 + $0x8] sm:$0xff]   ;;  %v593_v7 = vld [vmem:[#allocation5 + $0x20] sm:$0xff]   ;;  %v599_v8 = vld [vmem:[#allocation7 + $0x10] sm:$0xff]  }
  0x4d   :  { %520 = vmatpush3.bf16.msra.mxu0 %v589_v1  ;;  %540 = vmatpush3.bf16.msra.mxu1 %v597_v4  ;;  %v594_v9 = vld [vmem:[#allocation5 + $0x28] sm:$0xff]   ;;  %v600_v10 = vld [vmem:[#allocation7 + $0x18] sm:$0xff]   ;;  %v595_v11 = vld [vmem:[#allocation5 + $0x30] sm:$0xff]  }
  0x4e   :  { %521 = vmatprep.subr.bf16.mxu0 %v769_v0  ;;  %541 = vmatprep.subr.bf16.mxu1 %v769_v0  ;;  %v596_v12 = vld [vmem:[#allocation5 + $0x38] sm:$0xff]   ;;  %v601_v14 = vld [vmem:[#allocation7 + $0x20] sm:$0xff]   ;;  %v602_v15 = vld [vmem:[#allocation7 + $0x28] sm:$0xff]  }
  0x4f   :  { %v84_v13 = vld [vmem:[#allocation2] sm:$0xf]  ;;  %v603_v16 = vld [vmem:[#allocation7 + $0x30] sm:$0xff]   ;;  %v605_v18 = vld [vmem:[#allocation8] sm:$0xff]  }
  0x50   :  { %v604_v17 = vld [vmem:[#allocation7 + $0x38] sm:$0xff]   ;;  %v606_v19 = vld [vmem:[#allocation8 + $0x8] sm:$0xff]   ;;  %v607_v20 = vld [vmem:[#allocation8 + $0x10] sm:$0xff]  }
  0x51   :  { %522 = vmatpush3.bf16.msra.mxu0 %v590_v2  ;;  %542 = vmatpush3.bf16.msra.mxu1 %v598_v6  ;;  %v608_v21 = vld [vmem:[#allocation8 + $0x18] sm:$0xff]   ;;  %v609_v30 = vld [vmem:[#allocation8 + $0x20] sm:$0xff]   ;;  %v610_v31 = vld [vmem:[#allocation8 + $0x28] sm:$0xff]  }
  0x52   :  { %523 = vmatprep.subr.bf16.mxu0 %v769_v0  ;;  %543 = vmatprep.subr.bf16.mxu1 %v769_v0  ;;  %v465_v22 = vld [vmem:[%s940_s2] ss:$0 sm:$0xff]  ;;  %v611_v32 = vld [vmem:[#allocation8 + $0x30] sm:$0xff]  }
  0x53   :  { %v612_v33 = vld [vmem:[#allocation8 + $0x38] sm:$0xff]  }
  0x54   :  { %v474_v34 = vld [vmem:[%s942_s4] ss:$0 sm:$0xff]  ;;  %s771_s4 = smov [#allocation10]  }
  0x55   :  { %524 = vmatpush3.bf16.msra.mxu0 %v591_v3  ;;  %544 = vmatpush3.bf16.msra.mxu1 %v599_v8  ;;  %v483_v42 = vld [vmem:[%s944_s6] ss:$0 sm:$0xff]  ;;  %s440_s11 = sshll.u32 %s771_s4, 4  ;;  %s441_s11 = int_to_ptr.vmem [resolvable:$true] %s440_s11 }
  0x56   :  { %525 = vmatprep.subr.bf16.mxu0 %v769_v0  ;;  %545 = vmatprep.subr.bf16.mxu1 %v769_v0  ;;  %s709_s12 = scalar_lea.vmem %s441_s11, 128  ;;  %p714_p5 = scmp.lt.s32.totalorder %s441_s11, %s441_s11 }
  0x57   :  { %p710_p4 = scmp.ne.s32.totalorder %s441_s11, %s709_s12  ;;  %p715_p6 = scmp.lt.s32.totalorder %s709_s12, %s709_s12 }
  0x59   :  { %526 = vmatpush3.bf16.msra.mxu0 %v592_v5  ;;  %546 = vmatpush3.bf16.msra.mxu1 %v600_v10  ;;  %p716_p7 = por %p715_p6, %p714_p5 }
  0x5a   :  { %527 = vmatprep.subr.bf16.mxu0 %v769_v0  ;;  %547 = vmatprep.subr.bf16.mxu1 %v769_v0 }
  0x5b   :  { %p717_p8 = pnand %p716_p7, %p710_p4 }
  0x5d   :  { %528 = vmatpush3.bf16.msra.mxu0 %v593_v7  ;;  %548 = vmatpush3.bf16.msra.mxu1 %v601_v14 }
  0x5e   :  { %529 = vmatprep.subr.bf16.mxu0 %v769_v0  ;;  %549 = vmatprep.subr.bf16.mxu1 %v769_v0 }
  0x61   :  { %530 = vmatpush3.bf16.msra.mxu0 %v594_v9  ;;  %550 = vmatpush3.bf16.msra.mxu1 %v602_v15 }
  0x62   :  { %531 = vmatprep.subr.bf16.mxu0 %v769_v0  ;;  %551 = vmatprep.subr.bf16.mxu1 %v769_v0 }
  0x65   :  { %532 = vmatpush3.bf16.msra.mxu0 %v595_v11  ;;  %552 = vmatpush3.bf16.msra.mxu1 %v603_v16 }
  0x66   :  { %533 = vmatprep.subr.bf16.mxu0 %v769_v0  ;;  %553 = vmatprep.subr.bf16.mxu1 %v769_v0 }
  0x69   :  { %534 = vmatpush3.bf16.msra.mxu0 %v596_v12  ;;  %554 = vmatpush3.bf16.msra.mxu1 %v604_v17 }
  0x6a   :  { %559 = vmatprep.subr.bf16.mxu0 %v769_v0 }
  0x6c   :  { %536 = vmatmul.mubr.bf16.vlgmr.msra.gmra.mrb[0].mxu0 %v84_v13 }
  0x6d   :  { %575 = vmatprep.mubr.msk.bf16.mxu0 %vm770_vm0, %v769_v0  ;;  %560 = vmatpush3.bf16.msra.mxu0 %v605_v18 }
  0x6e   :  { %561 = vmatprep.subr.bf16.mxu0 %v769_v0 }
  0x71   :  { %562 = vmatpush3.bf16.msra.mxu0 %v606_v19 }
  0x72   :  { %563 = vmatprep.subr.bf16.mxu0 %v769_v0 }
  0x75   :  { %564 = vmatpush3.bf16.msra.mxu0 %v607_v20 }
  0x76   :  { %565 = vmatprep.subr.bf16.mxu0 %v769_v0 }
  0x79   :  { %566 = vmatpush3.bf16.msra.mxu0 %v608_v21 }
  0x7a   :  { %567 = vmatprep.subr.bf16.mxu0 %v769_v0 }
  0x7d   :  { %568 = vmatpush3.bf16.msra.mxu0 %v609_v30 }
  0x7e   :  { %569 = vmatprep.subr.bf16.mxu0 %v769_v0 }
  0x81   :  { %570 = vmatpush3.bf16.msra.mxu0 %v610_v31 }
  0x82   :  { %571 = vmatprep.subr.bf16.mxu0 %v769_v0 }
  0x85   :  { %572 = vmatpush3.bf16.msra.mxu0 %v611_v32 }
  0x86   :  { %573 = vmatprep.subr.bf16.mxu0 %v769_v0 }
  0x89   :  { %574 = vmatpush3.bf16.msra.mxu0 %v612_v33 }
 0x13f   :  { %v190_v23 = vpop.f32.mrb[0].mxu0 }
 0x140   :  { %v191_v24 = vadd.f32 %v465_v22, %v190_v23  ;;  %v537_v25 = vpop.f32.mrb[1].mxu0 }
 0x141   :  { %v193_v26 = vpop.f32.mrb[2].mxu0 }
 0x142   :  { %613 = vtanh.f32 %v191_v24  ;;  %v538_v27 = vpop.f32.mrb[3].mxu0 }
 0x14c   :  { %v614_v28 = vpop.eup %613 }
 0x14d   :  { %v197_v29 = vpack.c.bf16 %v614_v28, %v614_v28 }
 0x14f   :  { %556 = vmatmul.mubr.bf16.vlgmr.msra.gmra.mrb[0].mxu1 %v197_v29 }
 0x222   :  { %v303_v35 = vpop.f32.mrb[0].mxu1 }
 0x223   :  { %v304_v36 = vadd.f32 %v474_v34, %v303_v35  ;;  %v557_v37 = vpop.f32.mrb[1].mxu1 }
 0x224   :  { %v306_v38 = vpop.f32.mrb[2].mxu1 }
 0x225   :  { %615 = vtanh.f32 %v304_v36  ;;  %v558_v39 = vpop.f32.mrb[3].mxu1 }
 0x22f   :  { %v616_v40 = vpop.eup %615 }
 0x230   :  { %v310_v41 = vpack.c.bf16 %v616_v40, %v616_v40 }
 0x232   :  { %576 = vmatmul.mubr.bf16.vlgmr.msra.gmra.mrb[4].mxu0 %v310_v41 }
 0x305   :  { %v416_v43 = vpop.f32.mrb[4].mxu0 }
 0x306   :  { %v417_v44 = vadd.f32 %v483_v42, %v416_v43  ;;  %v577_v45 = vpop.f32.mrb[5].mxu0 }
 0x307   :  { %v419_v46 = vpop.f32.mrb[6].mxu0 }
 0x308   :  { %431 = vst [vmem:[#allocation10] sm:$0xff] %v417_v44  ;;  %422 = vmax.xlane.f32.xlu0 %v417_v44  ;;  %v578_v47 = vpop.f32.mrb[7].mxu0 }
 0x395   :  { %v423_v48 = vpop.xlane.xlu0 %422 }
 0x396   :  { %v424_v49 = vsub.f32 %v417_v44, %v423_v48 }
 0x398   :  { %v425_v50 = vmul.f32 1.442695, %v424_v49 }
 0x39a   :  { %617 = vpow2.f32 %v425_v50 }
 0x3a4   :  { %v618_v51 = vpop.eup %617 }
 0x3a5   :  { %427 = vadd.xlane.f32.xlu0 %v618_v51 }
 0x3a6   :  { %720 = shalt.err (!%p717_p8)
}
 0x3a7   :  { %s721_s14 = scalar_lea.hbm %s945_s7, 128 }
 0x3a8   :  { %p722_p9 = scmp.ne.s32.totalorder %s945_s7, %s721_s14  ;;  %p725_p10 = scmp.lt.u32.totalorder %s721_s14, %s945_s7 }
 0x3aa   :  { %p727_p11 = pnand %p725_p10, %p722_p9 }
 0x3ac   :  { %730 = shalt.err (!%p727_p11)
}
 0x3ad   :  { %443 = dma.vmem_to_hbm [thread:$0]  %s441_s11, 128, %s945_s7, [#allocation4]  }
 0x3ae   :  { %s772_s23 = smov [#allocation11]  }
 0x3af   :  { %s450_s24 = sshll.u32 %s772_s23, 4  ;;  %s451_s24 = int_to_ptr.vmem [resolvable:$true] %s450_s24 }
 0x3b0   :  { %s731_s25 = scalar_lea.vmem %s451_s24, 128  ;;  %p736_p13 = scmp.lt.s32.totalorder %s451_s24, %s451_s24 }
 0x3b1   :  { %p732_p12 = scmp.ne.s32.totalorder %s451_s24, %s731_s25  ;;  %p737_p0 = scmp.lt.s32.totalorder %s731_s25, %s731_s25 }
 0x3b3   :  { %p738_p1 = por %p737_p0, %p736_p13 }
 0x3b5   :  { %p739_p2 = pnand %p738_p1, %p732_p12 }
 0x432   :  { %v428_v52 = vpop.xlane.xlu0 %427 }
 0x433   :  { %619 = vlog2.f32 %v428_v52 }
 0x43d   :  { %v620_v53 = vpop.eup %619 }
 0x43e   :  { %v430_v54 = vmul.f32 0.6931472, %v620_v53 }
 0x440   :  { %v432_v55 = vsub.f32 %v424_v49, %v430_v54 }
 0x442   :  { %433 = vst [vmem:[#allocation11] sm:$0xff] %v432_v55 }
 0x443   :  { %742 = shalt.err (!%p739_p2)
}
 0x444   :  { %s743_s7 = scalar_lea.hbm %s946_s8, 128 }
 0x445   :  { %p744_p3 = scmp.ne.s32.totalorder %s946_s8, %s743_s7  ;;  %p747_p4 = scmp.lt.u32.totalorder %s743_s7, %s946_s8 }
 0x447   :  { %p749_p5 = pnand %p747_p4, %p744_p3 }
 0x449   :  { %752 = shalt.err (!%p749_p5)
}
 0x44a   :  { %453 = dma.vmem_to_hbm [thread:$0]  %s451_s24, 128, %s946_s8, [#allocation12]  }
 0x44b   :  { %759 = dma.done.wait [#allocation4], 128  }
 0x44c   :  { %760 = vsyncadd [#allocation4], 4294967168 }
 0x44d   :  { %761 = dma.done.wait [#allocation12], 128  }
 0x44e   :  { %762 = vsyncadd [#allocation12], 4294967168 }
 0x44f   :  { %460 = vsyncpa [#allocation3], 1 }
 0x450   :  { %461 = vsyncpa [#allocation6], 1 }
 0x451   :  { %462 = vsyncpa [#allocation9], 1 }
 0x452   :  { %463 = vsyncpa [#allocation4], 1 }
 0x453   :  { %464 = vsyncpa [#allocation12], 1 }

</bundles_post_ra>
